<compile_context>
chip_gen: v6e
topology: v6e:2x2x1
jax: 0.10.0
libtpu: 0.0.40
codegen_flags: <defaults>
</compile_context>

<pallas_src>
import functools
import math

import jax
import jax.numpy as jnp
from jax import lax
from jax.experimental import pallas as pl
from jax.experimental.pallas import tpu as pltpu

EPSILON = 1e-05


def _dice_sums_kernel(logits_ref, labels_ref, num_out, den1_out, den2_out,
                      num_acc, den1_acc, den2_acc,
                      *, squared, masked, approx_recip, chunk_rows):
    """One (voxel-split, sample, voxel-tile) grid step.

    logits_ref: (C, tile_rows, 128)   caller dtype (f32 math in-kernel)
    labels_ref: (tile_rows, 128)      int32, -1 marks padded voxels
    *_out:      (C, 128)              lane-partial class sums (written at last tile)
    *_acc:      (C, chunk_rows, 128)  f32 running accumulators
    """
    t = pl.program_id(2)
    nt = pl.num_programs(2)

    C, tile_rows, lanes = logits_ref.shape
    n_chunks = tile_rows // chunk_rows

    # Zero the per-(split, sample) accumulators at the first voxel tile.
    @pl.when(t == 0)
    def _():
        num_acc[...] = jnp.zeros_like(num_acc)
        den1_acc[...] = jnp.zeros_like(den1_acc)
        den2_acc[...] = jnp.zeros_like(den2_acc)

    # Hoisted out of the chunk loop (JAX does not CSE broadcast/iota).
    class_ids = lax.broadcasted_iota(jnp.int32, (C, chunk_rows, lanes), 0)

    def body(k, carry):
        r0 = pl.multiple_of(k * chunk_rows, chunk_rows)
        x = logits_ref[:, pl.ds(r0, chunk_rows), :].astype(jnp.float32)
        lab = labels_ref[pl.ds(r0, chunk_rows), :]              # (chunk, 128)

        # Per-voxel softmax over classes: elementwise max/sum over the C
        # sub-blocks (VPU) + one EUP reciprocal per voxel.
        m = jnp.max(x, axis=0, keepdims=True)
        e = jnp.exp(x - m)
        s = jnp.sum(e, axis=0, keepdims=True)
        p = e * pl.reciprocal(s, approx=approx_recip)           # (C, chunk, 128)

        mask = class_ids == lab[None, :, :]                     # one-hot (bool)

        # Padded voxels carry label -1 -> mask is all-false, so num / den2 are
        # automatically unaffected; only den1 needs explicit masking.
        num_acc[...] += jnp.where(mask, p, 0.0)
        den2_acc[...] += mask.astype(jnp.float32)               # onehot**2 == onehot
        d1 = p * p if squared else p
        if masked:
            d1 = jnp.where((lab >= 0)[None, :, :], d1, 0.0)
        den1_acc[...] += d1
        return carry

    lax.fori_loop(0, n_chunks, body, 0)

    # Epilogue once per (split, sample): fold the chunk sublanes, keep lane
    # partials; the tiny cross-lane reduce + dice math runs in the wrapper.
    @pl.when(t == nt - 1)
    def _():
        num_out[...] = jnp.sum(num_acc[...], axis=1)
        den1_out[...] = jnp.sum(den1_acc[...], axis=1)
        den2_out[...] = jnp.sum(den2_acc[...], axis=1)


def _round_up(x, m):
    return -(-x // m) * m


def _vmem_capacity_bytes():
    """Generation-aware VMEM capacity (v5e/v6e 128 MiB, v7x 64 MiB)."""
    try:
        return int(pltpu.get_tpu_info().vmem_capacity_bytes)
    except Exception:
        return 64 << 20  # conservative default (v7x)


def _choose_tile_rows(rows_split_min, C, logits_itemsize, chunk_rows,
                      budget_bytes, max_tile_rows=2048):
    """Largest tile (in 128-voxel rows) whose double-buffered input blocks fit
    the budget, capped at max_tile_rows (= 256K voxels) and the split size."""
    per_row_bytes = 2 * (C * 128 * logits_itemsize + 128 * 4)  # logits + int32 labels
    budget_rows = max(chunk_rows, budget_bytes // per_row_bytes)
    tile_rows = min(budget_rows, max_tile_rows, rows_split_min)
    tile_rows = max(chunk_rows, (tile_rows // chunk_rows) * chunk_rows)
    return int(tile_rows)


def mean_dice_loss(input_batch, target, *, squared=True, reduction='mean',
                   num_voxel_splits=2, voxel_tile_rows=None,
                   approx_reciprocal=True):
    """Pallas implementation of MeanDiceLoss.forward.

    input_batch: (B, C, *spatial) logits (any float dtype; math is f32).
    target:      (B, *spatial) or (B, 1, *spatial) integer labels in [0, C).
    """
    assert reduction in ('mean', 'sum', 'none')
    B = input_batch.shape[0]
    C = input_batch.shape[1]
    V = int(math.prod(input_batch.shape[2:]))

    logits = input_batch
    if not jnp.issubdtype(logits.dtype, jnp.floating):
        logits = logits.astype(jnp.float32)
    # NOTE: no wrapper-side bf16 cast -- a standalone XLA cast is an extra full
    # HBM pass and a numerics change; the kernel consumes the caller's dtype.
    logits = logits.reshape(B, C, V)
    labels = target.reshape(B, -1).astype(jnp.int32)

    itemsize = jnp.dtype(logits.dtype).itemsize
    chunk_rows = max(8, 32 // itemsize)          # sublane granule of the dtype

    S = max(1, int(num_voxel_splits))            # megacore voxel-split axis
    raw_rows = -(-V // 128)
    rows_split_min = _round_up(max(1, -(-raw_rows // S)), chunk_rows)

    vmem_cap = _vmem_capacity_bytes()
    budget = int(vmem_cap * 0.6)                 # ~38 MiB v7x, ~77 MiB v5e/v6e
    if voxel_tile_rows is None:
        tile_rows = _choose_tile_rows(rows_split_min, C, itemsize, chunk_rows,
                                      budget)
    else:
        tile_rows = _round_up(int(voxel_tile_rows), chunk_rows)

    rows_per_split = _round_up(rows_split_min, tile_rows)
    total_rows = rows_per_split * S
    nt = rows_per_split // tile_rows
    V_pad = total_rows * 128
    masked = V_pad != V

    if masked:
        # Pad + mask path: padded voxels get label -1 (one-hot all-false) and
        # their softmax is masked out of den1 in-kernel.
        logits = jnp.pad(logits, ((0, 0), (0, 0), (0, V_pad - V)))
        labels = jnp.pad(labels, ((0, 0), (0, V_pad - V)), constant_values=-1)
    logits = logits.reshape(B, C, total_rows, 128)
    labels = labels.reshape(B, total_rows, 128)

    kernel = functools.partial(_dice_sums_kernel, squared=squared,
                               masked=masked, approx_recip=approx_reciprocal,
                               chunk_rows=chunk_rows)

    out_shape = tuple(jax.ShapeDtypeStruct((S, B, C, 128), jnp.float32)
                      for _ in range(3))

    # VMEM accounting: double-buffered inputs + outputs, single accumulators.
    logits_block = C * tile_rows * 128 * itemsize
    labels_block = tile_rows * 128 * 4
    out_block = max(C, 8) * 128 * 4
    acc_bytes = C * chunk_rows * 128 * 4
    needed = 2 * (logits_block + labels_block) + 2 * 3 * out_block + 3 * acc_bytes
    vmem_limit = int(min(int(vmem_cap * 0.85),
                         max(needed + (8 << 20), 32 << 20)))

    num_p, den1_p, den2_p = pl.pallas_call(
        kernel,
        out_shape=out_shape,
        grid_spec=pltpu.PrefetchScalarGridSpec(
            num_scalar_prefetch=0,
            grid=(S, B, nt),
            in_specs=[
                pl.BlockSpec((None, C, tile_rows, 128),
                             lambda s, b, t: (b, 0, s * nt + t, 0)),
                pl.BlockSpec((None, tile_rows, 128),
                             lambda s, b, t: (b, s * nt + t, 0)),
            ],
            out_specs=[
                pl.BlockSpec((None, None, C, 128), lambda s, b, t: (s, b, 0, 0)),
                pl.BlockSpec((None, None, C, 128), lambda s, b, t: (s, b, 0, 0)),
                pl.BlockSpec((None, None, C, 128), lambda s, b, t: (s, b, 0, 0)),
            ],
            scratch_shapes=[
                pltpu.VMEM((C, chunk_rows, 128), jnp.float32),  # num
                pltpu.VMEM((C, chunk_rows, 128), jnp.float32),  # den1
                pltpu.VMEM((C, chunk_rows, 128), jnp.float32),  # den2
            ],
        ),
        compiler_params=pltpu.CompilerParams(
            dimension_semantics=("parallel", "parallel", "arbitrary"),
            vmem_limit_bytes=vmem_limit),
    )(logits, labels)

    # Combine per-(split, sample) lane partials and finish the dice in f32.
    num = num_p.sum(axis=(0, 3))      # (B, C)
    den1 = den1_p.sum(axis=(0, 3))
    den2 = den2_p.sum(axis=(0, 3))
    dice = 2.0 * num / (den1 + den2 + EPSILON)
    loss = 1.0 - jnp.mean(dice, axis=1)
    if reduction == 'sum':
        return loss.sum()
    if reduction == 'none':
        return loss
    return loss.mean()


def _reference_mean_dice_loss(input_batch, target, squared=True,
                              reduction='mean'):
    """Pure-JAX reference mirroring the PyTorch module (f32 end to end)."""
    B, C = input_batch.shape[0], input_batch.shape[1]
    flat_input = input_batch.reshape(B, C, -1).astype(jnp.float32)
    flat_target = target.reshape(B, -1)
    pred = jax.nn.softmax(flat_input, axis=1)                       # (B, C, V)
    tgt = jax.nn.one_hot(flat_target, C, dtype=jnp.float32)         # (B, V, C)
    tgt = jnp.transpose(tgt, (0, 2, 1))                             # (B, C, V)
    num = jnp.sum(pred * tgt, axis=2)
    if squared:
        den1 = jnp.sum(pred * pred, axis=2)
        den2 = jnp.sum(tgt * tgt, axis=2)
    else:
        den1 = jnp.sum(pred, axis=2)
        den2 = jnp.sum(tgt, axis=2)
    dice = 2.0 * num / (den1 + den2 + EPSILON)
    loss = 1.0 - jnp.mean(dice, axis=1)
    if reduction == 'sum':
        return loss.sum()
    if reduction == 'none':
        return loss
    return loss.mean()


if __name__ == "__main__":
    key = jax.random.PRNGKey(0)
    k1, k2, k3, k4 = jax.random.split(key, 4)

    # 2-D case: (B, C, H, W) logits, (B, H, W) int targets.
    B, C, H, W = 2, 4, 16, 16
    logits = jax.random.normal(k1, (B, C, H, W), dtype=jnp.float32)
    labels = jax.random.randint(k2, (B, H, W), 0, C, dtype=jnp.int32)

    loss = jax.block_until_ready(
        mean_dice_loss(logits, labels, squared=True, reduction='mean'))
    ref = _reference_mean_dice_loss(logits, labels, squared=True,
                                    reduction='mean')
    # Default path uses the EUP approximate reciprocal -> loose-ish tolerance.
    assert jnp.allclose(loss, ref, atol=5e-3, rtol=0.0), (loss, ref)

    # Exact-reciprocal path matches the f32 reference tightly.
    loss_exact = jax.block_until_ready(
        mean_dice_loss(logits, labels, squared=True, reduction='mean',
                       approx_reciprocal=False))
    assert jnp.allclose(loss_exact, ref, atol=1e-5, rtol=1e-5), (loss_exact, ref)

    # 'none' reduction, squared=False.
    loss_none = jax.block_until_ready(
        mean_dice_loss(logits, labels, squared=False, reduction='none',
                       approx_reciprocal=False))
    ref_none = _reference_mean_dice_loss(logits, labels, squared=False,
                                         reduction='none')
    assert jnp.allclose(loss_none, ref_none, atol=1e-5, rtol=1e-5), (
        loss_none, ref_none)

    # 3-D case with an odd voxel count (exercises the pad+mask path) and a
    # (B, 1, D, H, W) target layout, 'sum' reduction.
    B3, C3, D3, H3, W3 = 1, 3, 5, 7, 9
    logits3 = jax.random.normal(k3, (B3, C3, D3, H3, W3), dtype=jnp.float32)
    labels3 = jax.random.randint(k4, (B3, 1, D3, H3, W3), 0, C3,
                                 dtype=jnp.int32)
    loss3 = jax.block_until_ready(
        mean_dice_loss(logits3, labels3, squared=True, reduction='sum',
                       approx_reciprocal=False))
    ref3 = _reference_mean_dice_loss(logits3, labels3, squared=True,
                                     reduction='sum')
    assert jnp.allclose(loss3, ref3, atol=1e-5, rtol=1e-5), (loss3, ref3)

    print("KERNEL_OK")
</pallas_src>

<mosaic_0001>
module attributes {stable_mosaic.version = 11 : i64} {
  func.func @_dice_sums_kernel(%arg0: i32, %arg1: i32, %arg2: i32, %arg3: memref<1x4x8x128xf32, #tpu.memory_space<vmem>>, %arg4: memref<1x8x128xi32, #tpu.memory_space<vmem>>, %arg5: memref<1x1x4x128xf32, #tpu.memory_space<vmem>>, %arg6: memref<1x1x4x128xf32, #tpu.memory_space<vmem>>, %arg7: memref<1x1x4x128xf32, #tpu.memory_space<vmem>>, %arg8: memref<4x8x128xf32, #tpu.memory_space<vmem>>, %arg9: memref<4x8x128xf32, #tpu.memory_space<vmem>>, %arg10: memref<4x8x128xf32, #tpu.memory_space<vmem>>) attributes {dimension_semantics = [#tpu.dimension_semantics<parallel>, #tpu.dimension_semantics<parallel>, #tpu.dimension_semantics<arbitrary>], iteration_bounds = array<i64: 2, 2, 1>, scalar_prefetch = 0 : i64, scratch_operands = 3 : i64, tpu.core_type = #tpu.core_type<tc>, window_params = [{transform_indices = @transform_0, window_bounds = array<i64: 1, 4, 8, 128>}, {transform_indices = @transform_1, window_bounds = array<i64: 1, 8, 128>}, {transform_indices = @transform_2, window_bounds = array<i64: 1, 1, 4, 128>}, {transform_indices = @transform_3, window_bounds = array<i64: 1, 1, 4, 128>}, {transform_indices = @transform_4, window_bounds = array<i64: 1, 1, 4, 128>}]} {
    %c0_i32 = arith.constant 0 : i32
    %0 = arith.cmpi eq, %arg2, %c0_i32 : i32
    %1 = arith.extui %0 : i1 to i32
    %c0_i32_0 = arith.constant 0 : i32
    %2 = arith.cmpi ne, %1, %c0_i32_0 : i32
    scf.if %2 {
      %cst_30 = arith.constant 0.000000e+00 : f32
      %49 = vector.broadcast %cst_30 : f32 to vector<4x8x128xf32>
      %c0_31 = arith.constant 0 : index
      %c0_32 = arith.constant 0 : index
      %c0_33 = arith.constant 0 : index
      %50 = vector.load %arg8[%c0_31, %c0_32, %c0_33] : memref<4x8x128xf32, #tpu.memory_space<vmem>>, vector<4x8x128xf32>
      tpu.vector_store %arg8[%c0_31, %c0_32, %c0_33], %49 {strides = array<i32>} : memref<4x8x128xf32, #tpu.memory_space<vmem>>, vector<4x8x128xf32>,
      %cst_34 = arith.constant 0.000000e+00 : f32
      %51 = vector.broadcast %cst_34 : f32 to vector<4x8x128xf32>
      %c0_35 = arith.constant 0 : index
      %c0_36 = arith.constant 0 : index
      %c0_37 = arith.constant 0 : index
      %52 = vector.load %arg9[%c0_35, %c0_36, %c0_37] : memref<4x8x128xf32, #tpu.memory_space<vmem>>, vector<4x8x128xf32>
      tpu.vector_store %arg9[%c0_35, %c0_36, %c0_37], %51 {strides = array<i32>} : memref<4x8x128xf32, #tpu.memory_space<vmem>>, vector<4x8x128xf32>,
      %cst_38 = arith.constant 0.000000e+00 : f32
      %53 = vector.broadcast %cst_38 : f32 to vector<4x8x128xf32>
      %c0_39 = arith.constant 0 : index
      %c0_40 = arith.constant 0 : index
      %c0_41 = arith.constant 0 : index
      %54 = vector.load %arg10[%c0_39, %c0_40, %c0_41] : memref<4x8x128xf32, #tpu.memory_space<vmem>>, vector<4x8x128xf32>
      tpu.vector_store %arg10[%c0_39, %c0_40, %c0_41], %53 {strides = array<i32>} : memref<4x8x128xf32, #tpu.memory_space<vmem>>, vector<4x8x128xf32>,
    } else {
    }
    %3 = tpu.iota {dimensions = array<i32: 0>} : vector<4x8x128xi32>
    %c0_i32_1 = arith.constant 0 : i32
    %c8_i32 = arith.constant 8 : i32
    %4 = arith.muli %c0_i32_1, %c8_i32 : i32
    %5 = tpu.assume_multiple %4, 8 : i32
    %c0 = arith.constant 0 : index
    %c0_2 = arith.constant 0 : index
    %6 = arith.index_cast %5 : i32 to index
    %c0_3 = arith.constant 0 : index
    %7 = vector.load %arg3[%c0, %c0_2, %6, %c0_3] : memref<1x4x8x128xf32, #tpu.memory_space<vmem>>, vector<1x4x8x128xf32>
    %8 = vector.shape_cast %7 : vector<1x4x8x128xf32> to vector<4x8x128xf32>
    %c0_4 = arith.constant 0 : index
    %9 = arith.index_cast %5 : i32 to index
    %c0_5 = arith.constant 0 : index
    %10 = vector.load %arg4[%c0_4, %9, %c0_5] : memref<1x8x128xi32, #tpu.memory_space<vmem>>, vector<1x8x128xi32>
    %11 = vector.shape_cast %10 : vector<1x8x128xi32> to vector<8x128xi32>
    %cst = arith.constant dense<0xFF800000> : vector<8x128xf32>
    %12 = vector.multi_reduction <maximumf>, %8, %cst [0] : vector<4x8x128xf32> to vector<8x128xf32>
    %13 = vector.shape_cast %12 : vector<8x128xf32> to vector<1x8x128xf32>
    %14 = vector.broadcast %13 : vector<1x8x128xf32> to vector<4x8x128xf32>
    %15 = arith.subf %8, %14 : vector<4x8x128xf32>
    %16 = math.exp %15 : vector<4x8x128xf32>
    %cst_6 = arith.constant dense<0.000000e+00> : vector<8x128xf32>
    %17 = vector.multi_reduction <add>, %16, %cst_6 [0] : vector<4x8x128xf32> to vector<8x128xf32>
    %18 = vector.shape_cast %17 : vector<8x128xf32> to vector<1x8x128xf32>
    %19 = tpu.reciprocal %18 {approx = true} : vector<1x8x128xf32> -> vector<1x8x128xf32>
    %20 = vector.broadcast %19 : vector<1x8x128xf32> to vector<4x8x128xf32>
    %21 = arith.mulf %16, %20 : vector<4x8x128xf32>
    %22 = vector.shape_cast %11 : vector<8x128xi32> to vector<1x8x128xi32>
    %23 = vector.broadcast %22 : vector<1x8x128xi32> to vector<4x8x128xi32>
    %24 = arith.cmpi eq, %3, %23 : vector<4x8x128xi32>
    %c0_7 = arith.constant 0 : index
    %c0_8 = arith.constant 0 : index
    %c0_9 = arith.constant 0 : index
    %25 = vector.load %arg8[%c0_7, %c0_8, %c0_9] : memref<4x8x128xf32, #tpu.memory_space<vmem>>, vector<4x8x128xf32>
    %cst_10 = arith.constant 0.000000e+00 : f32
    %26 = vector.broadcast %cst_10 : f32 to vector<4x8x128xf32>
    %27 = arith.select %24, %21, %26 : vector<4x8x128xi1>, vector<4x8x128xf32>
    %28 = arith.addf %25, %27 : vector<4x8x128xf32>
    %c0_11 = arith.constant 0 : index
    %c0_12 = arith.constant 0 : index
    %c0_13 = arith.constant 0 : index
    %29 = vector.load %arg8[%c0_11, %c0_12, %c0_13] : memref<4x8x128xf32, #tpu.memory_space<vmem>>, vector<4x8x128xf32>
    tpu.vector_store %arg8[%c0_11, %c0_12, %c0_13], %28 {strides = array<i32>} : memref<4x8x128xf32, #tpu.memory_space<vmem>>, vector<4x8x128xf32>,
    %c0_14 = arith.constant 0 : index
    %c0_15 = arith.constant 0 : index
    %c0_16 = arith.constant 0 : index
    %30 = vector.load %arg10[%c0_14, %c0_15, %c0_16] : memref<4x8x128xf32, #tpu.memory_space<vmem>>, vector<4x8x128xf32>
    %31 = arith.extui %24 : vector<4x8x128xi1> to vector<4x8x128xi32>
    %32 = arith.sitofp %31 : vector<4x8x128xi32> to vector<4x8x128xf32>
    %33 = arith.addf %30, %32 : vector<4x8x128xf32>
    %c0_17 = arith.constant 0 : index
    %c0_18 = arith.constant 0 : index
    %c0_19 = arith.constant 0 : index
    %34 = vector.load %arg10[%c0_17, %c0_18, %c0_19] : memref<4x8x128xf32, #tpu.memory_space<vmem>>, vector<4x8x128xf32>
    tpu.vector_store %arg10[%c0_17, %c0_18, %c0_19], %33 {strides = array<i32>} : memref<4x8x128xf32, #tpu.memory_space<vmem>>, vector<4x8x128xf32>,
    %35 = arith.mulf %21, %21 : vector<4x8x128xf32>
    %c0_i32_20 = arith.constant 0 : i32
    %36 = vector.broadcast %c0_i32_20 : i32 to vector<8x128xi32>
    %37 = arith.cmpi sge, %11, %36 : vector<8x128xi32>
    %38 = vector.shape_cast %37 : vector<8x128xi1> to vector<1x8x128xi1>
    %cst_21 = arith.constant 0.000000e+00 : f32
    %39 = vector.shape_cast %38 : vector<1x8x128xi1> to vector<1x8x128xi1>
    %40 = vector.broadcast %39 : vector<1x8x128xi1> to vector<4x8x128xi1>
    %41 = vector.broadcast %cst_21 : f32 to vector<4x8x128xf32>
    %42 = arith.select %40, %35, %41 : vector<4x8x128xi1>, vector<4x8x128xf32>
    %c0_22 = arith.constant 0 : index
    %c0_23 = arith.constant 0 : index
    %c0_24 = arith.constant 0 : index
    %43 = vector.load %arg9[%c0_22, %c0_23, %c0_24] : memref<4x8x128xf32, #tpu.memory_space<vmem>>, vector<4x8x128xf32>
    %44 = arith.addf %43, %42 : vector<4x8x128xf32>
    %c0_25 = arith.constant 0 : index
    %c0_26 = arith.constant 0 : index
    %c0_27 = arith.constant 0 : index
    %45 = vector.load %arg9[%c0_25, %c0_26, %c0_27] : memref<4x8x128xf32, #tpu.memory_space<vmem>>, vector<4x8x128xf32>
    tpu.vector_store %arg9[%c0_25, %c0_26, %c0_27], %44 {strides = array<i32>} : memref<4x8x128xf32, #tpu.memory_space<vmem>>, vector<4x8x128xf32>,
    %c1_i32 = arith.constant 1 : i32
    %c0_i32_28 = arith.constant 0 : i32
    %46 = arith.cmpi eq, %arg2, %c0_i32_28 : i32
    %47 = arith.extui %46 : i1 to i32
    %c0_i32_29 = arith.constant 0 : i32
    %48 = arith.cmpi ne, %47, %c0_i32_29 : i32
    scf.if %48 {
      %c0_30 = arith.constant 0 : index
      %c0_31 = arith.constant 0 : index
      %c0_32 = arith.constant 0 : index
      %49 = vector.load %arg8[%c0_30, %c0_31, %c0_32] : memref<4x8x128xf32, #tpu.memory_space<vmem>>, vector<4x8x128xf32>
      %cst_33 = arith.constant dense<0.000000e+00> : vector<4x128xf32>
      %50 = vector.multi_reduction <add>, %49, %cst_33 [1] : vector<4x8x128xf32> to vector<4x128xf32>
      %c0_34 = arith.constant 0 : index
      %c0_35 = arith.constant 0 : index
      %c0_36 = arith.constant 0 : index
      %c0_37 = arith.constant 0 : index
      %51 = vector.load %arg5[%c0_34, %c0_35, %c0_36, %c0_37] : memref<1x1x4x128xf32, #tpu.memory_space<vmem>>, vector<1x1x4x128xf32>
      %52 = vector.shape_cast %51 : vector<1x1x4x128xf32> to vector<4x128xf32>
      %53 = vector.shape_cast %50 : vector<4x128xf32> to vector<1x1x4x128xf32>
      tpu.vector_store %arg5[%c0_34, %c0_35, %c0_36, %c0_37], %53 {strides = array<i32>} : memref<1x1x4x128xf32, #tpu.memory_space<vmem>>, vector<1x1x4x128xf32>,
      %c0_38 = arith.constant 0 : index
      %c0_39 = arith.constant 0 : index
      %c0_40 = arith.constant 0 : index
      %54 = vector.load %arg9[%c0_38, %c0_39, %c0_40] : memref<4x8x128xf32, #tpu.memory_space<vmem>>, vector<4x8x128xf32>
      %cst_41 = arith.constant dense<0.000000e+00> : vector<4x128xf32>
      %55 = vector.multi_reduction <add>, %54, %cst_41 [1] : vector<4x8x128xf32> to vector<4x128xf32>
      %c0_42 = arith.constant 0 : index
      %c0_43 = arith.constant 0 : index
      %c0_44 = arith.constant 0 : index
      %c0_45 = arith.constant 0 : index
      %56 = vector.load %arg6[%c0_42, %c0_43, %c0_44, %c0_45] : memref<1x1x4x128xf32, #tpu.memory_space<vmem>>, vector<1x1x4x128xf32>
      %57 = vector.shape_cast %56 : vector<1x1x4x128xf32> to vector<4x128xf32>
      %58 = vector.shape_cast %55 : vector<4x128xf32> to vector<1x1x4x128xf32>
      tpu.vector_store %arg6[%c0_42, %c0_43, %c0_44, %c0_45], %58 {strides = array<i32>} : memref<1x1x4x128xf32, #tpu.memory_space<vmem>>, vector<1x1x4x128xf32>,
      %c0_46 = arith.constant 0 : index
      %c0_47 = arith.constant 0 : index
      %c0_48 = arith.constant 0 : index
      %59 = vector.load %arg10[%c0_46, %c0_47, %c0_48] : memref<4x8x128xf32, #tpu.memory_space<vmem>>, vector<4x8x128xf32>
      %cst_49 = arith.constant dense<0.000000e+00> : vector<4x128xf32>
      %60 = vector.multi_reduction <add>, %59, %cst_49 [1] : vector<4x8x128xf32> to vector<4x128xf32>
      %c0_50 = arith.constant 0 : index
      %c0_51 = arith.constant 0 : index
      %c0_52 = arith.constant 0 : index
      %c0_53 = arith.constant 0 : index
      %61 = vector.load %arg7[%c0_50, %c0_51, %c0_52, %c0_53] : memref<1x1x4x128xf32, #tpu.memory_space<vmem>>, vector<1x1x4x128xf32>
      %62 = vector.shape_cast %61 : vector<1x1x4x128xf32> to vector<4x128xf32>
      %63 = vector.shape_cast %60 : vector<4x128xf32> to vector<1x1x4x128xf32>
      tpu.vector_store %arg7[%c0_50, %c0_51, %c0_52, %c0_53], %63 {strides = array<i32>} : memref<1x1x4x128xf32, #tpu.memory_space<vmem>>, vector<1x1x4x128xf32>,
    } else {
    }
    return
  }
  func.func @transform_0(%arg0: i32, %arg1: i32, %arg2: i32) -> (i32, i32, i32, i32) {
    %c1_i32 = arith.constant 1 : i32
    %0 = arith.muli %arg0, %c1_i32 : i32
    %1 = arith.addi %0, %arg2 : i32
    %c0_i32 = arith.constant 0 : i32
    %c0_i32_0 = arith.constant 0 : i32
    %c0_i32_1 = arith.constant 0 : i32
    return %arg1, %c0_i32, %1, %c0_i32_0 : i32, i32, i32, i32
  }
  func.func @transform_1(%arg0: i32, %arg1: i32, %arg2: i32) -> (i32, i32, i32) {
    %c1_i32 = arith.constant 1 : i32
    %0 = arith.muli %arg0, %c1_i32 : i32
    %1 = arith.addi %0, %arg2 : i32
    %c0_i32 = arith.constant 0 : i32
    %c0_i32_0 = arith.constant 0 : i32
    return %arg1, %1, %c0_i32 : i32, i32, i32
  }
  func.func @transform_2(%arg0: i32, %arg1: i32, %arg2: i32) -> (i32, i32, i32, i32) {
    %c0_i32 = arith.constant 0 : i32
    %c0_i32_0 = arith.constant 0 : i32
    %c0_i32_1 = arith.constant 0 : i32
    return %arg0, %arg1, %c0_i32, %c0_i32_0 : i32, i32, i32, i32
  }
  func.func @transform_3(%arg0: i32, %arg1: i32, %arg2: i32) -> (i32, i32, i32, i32) {
    %c0_i32 = arith.constant 0 : i32
    %c0_i32_0 = arith.constant 0 : i32
    %c0_i32_1 = arith.constant 0 : i32
    return %arg0, %arg1, %c0_i32, %c0_i32_0 : i32, i32, i32, i32
  }
  func.func @transform_4(%arg0: i32, %arg1: i32, %arg2: i32) -> (i32, i32, i32, i32) {
    %c0_i32 = arith.constant 0 : i32
    %c0_i32_0 = arith.constant 0 : i32
    %c0_i32_1 = arith.constant 0 : i32
    return %arg0, %arg1, %c0_i32, %c0_i32_0 : i32, i32, i32, i32
  }
}

</mosaic_0001>

<bundles_post_ra>
// kernel: tpu_custom_call.1
= control target key start
LH: loop header
LB: loop body
LE: loop exit
PB: predicated region body
PF: predicated region fallthrough
CT: control target
= control target key end

     0   :  { %s1461_s0 = inlined_call_operand.hbm [shape: f32[2,4,16,128], index: 0, kind: input, shape index: {}]   ;;  %s1462_s1 = inlined_call_operand.hbm [shape: s32[2,16,128], index: 1, kind: input, shape index: {}]   ;;  %s1463_s2 = inlined_call_operand.hbm [shape: f32[2,2,4,128], index: 2, kind: output, shape index: {0}]   ;;  %s1464_s3 = inlined_call_operand.hbm [shape: f32[2,2,4,128], index: 3, kind: output, shape index: {1}]   ;;  %s1465_s4 = inlined_call_operand.hbm [shape: f32[2,2,4,128], index: 4, kind: output, shape index: {2}]  }
   0x1   :  { %1474 = sst [smem:[#allocation24_spill]] %s1461_s0 }
   0x2   :  { %1475 = sst [smem:[#allocation25_spill]] %s1463_s2 }
   0x3   :  { %1476 = sst [smem:[#allocation26_spill]] %s1465_s4 }
   0x4   :  { %10 = vsyncpa [#allocation6], 0 }
   0x5   :  { %12 = vsyncpa [#allocation6 + $0x1], 0 }
   0x6   :  { %13 = vsyncpa [#allocation9], 0 }
   0x7   :  { %15 = vsyncpa [#allocation9 + $0x1], 0 }
   0x8   :  { %16 = vsyncpa [#allocation7], 0 }
   0x9   :  { %18 = vsyncpa [#allocation7 + $0x1], 0 }
   0xa   :  { %19 = vsyncpa [#allocation12], 0 }
   0xb   :  { %21 = vsyncpa [#allocation12 + $0x1], 0  ;;  %s1157_s15 = smov 0   ;;  %s1159_s16 = smov 0  }
   0xc   :  { %s1161_s17 = smov 0   ;;  %s1163_s18 = smov 0  }
   0xd   :  { %s1165_s19 = smov 0   ;;  %s1167_s20 = smov 0  }
   0xe   :  { %s1169_s21 = smov 0   ;;  %s1171_s22 = smov 0  }
   0xf LB: > { %1477 = sst [smem:[#allocation18_spill]] %s1093_s15  ;;  %s1198_s23 = sadd.s32 4294967295, %s1121_s22   ;;  %s1121_s22 = sphi %s1171_s22, %s27_s22   ;;  %s1117_s21 = sphi %s1169_s21, %s1504_s21   ;;  %s1113_s20 = sphi %s1167_s20, %s1503_s20   ;;  %s1109_s19 = sphi %s1165_s19, %s1502_s19   ;;  %s1105_s18 = sphi %s1163_s18, %s1501_s18   ;;  %s1101_s17 = sphi %s1161_s17, %s1496_s17   ;;  %s1097_s16 = sphi %s1159_s16, %s1500_s16   ;;  %s1093_s15 = sphi %s1157_s15, %s1499_s15  }
  0x10   : > { %1478 = sst [smem:[#allocation19_spill]] %s1101_s17  ;;  %s1468_s24 = sadd.s32 4294967294, %s1121_s22  }
  0x11   : > { %s42_s25 = sadd.s32 1, %s1113_s20  ;;  %s46_s26 = sadd.s32 1, %s1117_s21 }
  0x12   : > { %p44_p0 = scmp.ge.s32.totalorder %s42_s25, 2  ;;  %s57_s27 = sadd.s32 1, %s1101_s17 }
  0x13   : > { %p64_p1 = scmp.ne.s32.totalorder %s1101_s17, %s1097_s16  ;;  %p65_p2 = scmp.eq.s32.totalorder %s1121_s22, 0 }
  0x14   : > { %s1506_s25 = smov (%p44_p0, %s42_s25), 0  ;;  %s1508_s26 = smov (!%p44_p0, %s46_s26), %s1117_s21 }
  0x15   : > { %1479 = sst [smem:[#allocation20_spill]] %s1506_s25  ;;  %s52_s28 = ssub.s32 %s1113_s20, %s1506_s25 }
  0x16   : > { %p1212_p3 = por %p65_p2, %p64_p1  ;;  %p48_p4 = scmp.ge.s32.totalorder %s1508_s26, 2 }
  0x17   : > { %p70_p5 = scmp.ne.s32.totalorder %s1097_s16, %s1093_s15  ;;  %p71_p6 = scmp.eq.s32.totalorder %s1198_s23, 0 }
  0x18   : > { %p126_p7 = scmp.eq.s32.totalorder %s1198_s23, 3  ;;  %s1510_s26 = smov (%p48_p4, %s1508_s26), 0 }
  0x19   : > { %1481 = sst [smem:[#allocation21_spill]] %s1510_s26  ;;  %p1222_p8 = por %p71_p6, %p70_p5 }
  0x1a   : > { %p1226_p9 = por %p126_p7, %p64_p1  ;;  %s53_s6 = ssub.s32 %s1117_s21, %s1510_s26 }
  0x1b   : > { %p132_p10 = scmp.eq.s32.totalorder %s1468_s24, 3  ;;  %s54_s7 = sor.u32 %s53_s6, %s52_s28 }
  0x1c   : > { %p55_p11 = scmp.eq.s32.totalorder %s54_s7, 0  ;;  %p829_p13 = scmp.lt.s32.totalorder %s1121_s22, 4 }
  0x1d   : > { %p1234_p12 = por %p132_p10, %p70_p5  ;;  %s1240_s9 = sand.u32 1, %s1101_s17  }
  0x1e   : > { %s1243_s10 = scalar_select %p55_p11, %s1101_s17, %s57_s27  }
  0x1f   : > { %s1484_s8 = scalar_select %p1234_p12, 1, 0 }
  0x20   : > { %1486 = sst [smem:[#allocation23_spill]] %s1243_s10  ;;  %s775_s11 = sshll.u32 %s1240_s9, 5 }
  0x21   : > { %1485 = sst [smem:[#allocation22_spill]] %s1484_s8  ;;  %s776_s12 = sshll.u32 %s1113_s20, 3 }
  0x22   : > { %s218_s13 = sadd.s32 %s1117_s21, %s776_s12  ;;  %s212_s14 = scalar_lea.vmem [#allocation5], %s775_s11 }
  0x23   : > { %s221_s26 = sshll.u32 %s212_s14, 4  ;;  %s777_s25 = sshll.u32 %s218_s13, 7  ;;  %s222_s26 = int_to_ptr.vmem [resolvable:$true] %s221_s26 }
  0x24   : > { %s1487_s0 = sld [smem:[#allocation24_spill]]  ;;  %p1253_p0 = pnand %p829_p13, %p1212_p3 }
  0x25   : > { %s209_s27 = scalar_lea.sflag [#allocation6], %s1240_s9  ;;  %s922_s10 = scalar_lea.vmem %s222_s26, 512 }
  0x26   : > { %p911_p1 = pneg %p1253_p0  ;;  %p923_p2 = scmp.ne.s32.totalorder %s222_s26, %s922_s10 }
  0x27   : > { %s1123_s11 = smov [#allocation5]  }
  0x28   : > { %p925_p4 = pnand %p923_p2, %p911_p1  ;;  %s927_s12 = sshll.u32 %s1123_s11, 4  ;;  %s928_s12 = int_to_ptr.vmem [resolvable:$false] %s927_s12 }
  0x29   : > { %p930_p6 = scmp.lt.s32.totalorder %s222_s26, %s928_s12 }
  0x2a   : > { %s220_s7 = scalar_lea.hbm %s1487_s0, %s777_s25  ;;  %p926_p5 = pneg %p925_p4 }
  0x2b   : > { %s929_s25 = scalar_lea.vmem %s928_s12, 1024 }
  0x2c   : > { %p931_p3 = scmp.lt.s32.totalorder %s929_s25, %s922_s10 }
  0x2e   : > { %p932_p7 = por %p931_p3, %p930_p6 }
  0x30   : > { %p933_p10 = pnand %p932_p7, %p926_p5 }
  0x32   : > { %936 = shalt.err (!%p933_p10)
}
  0x33   : > { %s1124_s29 = smov 256   ;;  %s1125_s13 = smov 128  }
  0x34   : > { %s1126_s14 = smov 8   ;;  %p781_p11 = scmp.ge.s32.totalorder %s1121_s22, 1 }
  0x35   : > { %815 = dma.hbm_to_vmem [thread:$0]  (!%p1253_p0), %s220_s7, 512, %s222_s26, %s209_s27, %s1124_s29, %s1125_s13, %s1126_s14  }
  0x36   : > { %p250_p13 = scmp.lt.s32.totalorder %s1121_s22, 5  ;;  %s778_s28 = sshll.u32 %s1240_s9, 3 }
  0x37   : > { %s779_s6 = sshll.u32 %s1113_s20, 1  ;;  %s235_s11 = scalar_lea.vmem [#allocation8], %s778_s28 }
  0x38   : > { %p1268_p2 = pnand %p781_p11, %p250_p13  ;;  %s245_s12 = sshll.u32 %s235_s11, 4  ;;  %s246_s12 = int_to_ptr.vmem [resolvable:$true] %s245_s12 }
  0x39   : > { %s241_s25 = sadd.s32 %s1117_s21, %s779_s6  ;;  %s232_s4 = scalar_lea.sflag [#allocation9], %s1240_s9 }
  0x3a   : > { %s780_s0 = sshll.u32 %s241_s25, 7  ;;  %s950_s2 = scalar_lea.vmem %s246_s12, 128 }
  0x3b   : > { %s243_s15 = scalar_lea.hbm %s1462_s1, %s780_s0  ;;  %p951_p4 = scmp.ne.s32.totalorder %s246_s12, %s950_s2 }
  0x3c   : > { %s1127_s26 = smov [#allocation8]  }
  0x3d   : > { %p953_p5 = pnand %p951_p4, %p911_p1  ;;  %s955_s7 = sshll.u32 %s1127_s26, 4  ;;  %s956_s7 = int_to_ptr.vmem [resolvable:$false] %s955_s7 }
  0x3e   : > { %s957_s27 = scalar_lea.vmem %s956_s7, 256  ;;  %p958_p3 = scmp.lt.s32.totalorder %s246_s12, %s956_s7 }
  0x3f   : > { %p954_p6 = pneg %p953_p5  ;;  %p959_p7 = scmp.lt.s32.totalorder %s957_s27, %s950_s2 }
  0x41   : > { %p960_p10 = por %p959_p7, %p958_p3 }
  0x43   : > { %p961_p11 = pnand %p960_p10, %p954_p6 }
  0x45   : > { %964 = shalt.err (!%p961_p11)
}
  0x46   : > { %818 = dma.hbm_to_vmem [thread:$0]  (!%p1253_p0), %s243_s15, 128, %s246_s12, %s232_s4  }
  0x47   : > { %254 = sbr.rel (%p1268_p2) target bundleno = 202 (0xca), region = 28  ;;  %s1286_s0 = sand.u32 (!%p1268_p2), 1, %s1097_s16  }
  0x48   : > { %s782_s17 = sshll.u32 (!%p1268_p2), %s1286_s0, 5  ;;  %s257_s8 = scalar_lea.sflag (!%p1268_p2), [#allocation6], %s1286_s0 }
  0x49   : > { %s260_s9 = scalar_lea.vmem (!%p1268_p2), [#allocation5], %s782_s17 }
  0x4c   : > { %1076 = dma.done.wait (%p1222_p8), %s257_s8, 512  }
  0x4d   : > { %1078 = vsyncadd (%p1222_p8), %s257_s8, 4294966784  ;;  %s783_s2 = sshll.u32 %s1286_s0, 3  ;;  %s266_s4 = scalar_lea.sflag [#allocation9], %s1286_s0 }
  0x4e   : > { %s269_s15 = scalar_lea.vmem [#allocation8], %s783_s2 }
  0x4f   : > { %1080 = dma.done.wait (%p1222_p8), %s266_s4, 128  }
  0x50   : > { %1082 = vsyncadd (%p1222_p8), %s266_s4, 4294967168  ;;  %v327_v0 = vld [vmem:[%s260_s9] sm:$0xff]  ;;  %v328_v1 = vld [vmem:[%s260_s9 + $0x8] sm:$0xff]  ;;  %v1128_v7 = vmov 0.0   ;;  %s1315_s24 = sshll.u32 %s1286_s0, 2  ;;  %vm453_vm4 = vcmask 1041409  }
  0x51   : > { %v329_v2 = vld [vmem:[%s260_s9 + $0x10] sm:$0xff]  ;;  %v330_v3 = vld [vmem:[%s260_s9 + $0x18] sm:$0xff]  ;;  %v1300_v4 = vld [vmem:[%s269_s15] sm:$0xff]  ;;  %v332_v5 = vmax.f32 %v327_v0, %v328_v1  ;;  %vm455_vm5 = vcmask 1042434   ;;  %vm457_vm6 = vcmask 1043459   ;;  %s308_s30 = scalar_lea.vmem [#allocation13], %s1315_s24 }
  0x52   : > { %v333_v6 = vmax.f32 %v329_v2, %v330_v3  ;;  %vm355_vm0 = vcmp.eq.s32.totalorder %v1300_v4, 0  ;;  %vm356_vm1 = vcmp.eq.s32.totalorder %v1300_v4, 1  ;;  %vm357_vm2 = vcmp.eq.s32.totalorder %v1300_v4, 2  ;;  %s794_s29 = sshll.u32 %s1109_s19, 1  ;;  %s301_s19 = scalar_lea.vmem [#allocation11], %s1315_s24 }
  0x53   : > { %vm358_vm3 = vcmp.eq.s32.totalorder %v1300_v4, 3  ;;  %v787_v8 = vsel %vm355_vm0, 1.0, %v1128_v7  ;;  %v788_v9 = vsel %vm356_vm1, 1.0, %v1128_v7  ;;  %v789_v11 = vsel %vm357_vm2, 1.0, %v1128_v7  ;;  %s557_s13 = sadd.s32 %s1105_s18, %s794_s29  ;;  %s576_s14 = sshll.u32 %s301_s19, 4  ;;  %s1337_s14 = int_to_ptr.vmem [resolvable:$true] %s576_s14 }
  0x54   : > { %v334_v10 = vmax.f32 %v332_v5, %v333_v6  ;;  %v790_v12 = vsel %vm358_vm3, 1.0, %v1128_v7  ;;  %v502_v13 = vrot.slane %v787_v8, 4  ;;  %v508_v14 = vrot.slane %v788_v9, 4  ;;  %s294_s28 = scalar_lea.vmem [#allocation10], %s1315_s24  ;;  %s540_s6 = sand.u32 1, %s1198_s23  }
  0x55   : > { %v514_v15 = vrot.slane %v789_v11, 4  ;;  %v520_v16 = vrot.slane %v790_v12, 4  ;;  %vm399_vm7 = vcmp.ge.s32.totalorder %v1300_v4, 0  ;;  %s561_s10 = sshll.u32 %s294_s28, 4  ;;  %s795_s18 = sshll.u32 %s557_s13, 6  ;;  %s1340_s10 = int_to_ptr.vmem [resolvable:$true] %s561_s10 }
  0x56   : > { %v335_v17 = vsub.f32 %v327_v0, %v334_v10  ;;  %v336_v18 = vsub.f32 %v328_v1, %v334_v10  ;;  %v337_v19 = vsub.f32 %v329_v2, %v334_v10  ;;  %v338_v20 = vsub.f32 %v330_v3, %v334_v10  ;;  %s591_s11 = sshll.u32 %s308_s30, 4  ;;  %s1349_s25 = scalar_lea.hbm %s1464_s3, %s795_s18  ;;  %s1359_s11 = int_to_ptr.vmem [resolvable:$true] %s591_s11 }
  0x57   : > { %v503_v21 = vadd.f32 %v787_v8, %v502_v13  ;;  %v509_v22 = vadd.f32 %v788_v9, %v508_v14  ;;  %v515_v23 = vadd.f32 %v789_v11, %v514_v15  ;;  %v521_v24 = vadd.f32 %v790_v12, %v520_v16  ;;  %s1490_s27 = sld [smem:[#allocation25_spill]]  ;;  %s1366_s15 = scalar_lea.sflag [#allocation12], %s540_s6 }
  0x58   : > { %v339_v25 = vmul.f32 1.442695, %v335_v17  ;;  %v341_v26 = vmul.f32 1.442695, %v336_v18  ;;  %v343_v27 = vmul.f32 1.442695, %v337_v19 }
  0x59   : > { %v345_v28 = vmul.f32 1.442695, %v338_v20  ;;  %v504_v29 = vrot.slane %v503_v21, 2  ;;  %v510_v30 = vrot.slane %v509_v22, 2  ;;  %v516_v31 = vrot.slane %v515_v23, 2  ;;  %s1491_s2 = sld [smem:[#allocation26_spill]] }
  0x5a   : > { %899 = vpow2.f32 %v339_v25  ;;  %v522_v32 = vrot.slane %v521_v24, 2  ;;  %s965_s24 = scalar_lea.vmem %s1337_s14, 64 }
  0x5b   : > { %901 = vpow2.f32 %v341_v26  ;;  %v505_v33 = vadd.f32 %v504_v29, %v503_v21  ;;  %v511_v34 = vadd.f32 %v510_v30, %v509_v22  ;;  %v517_v35 = vadd.f32 %v516_v31, %v515_v23  ;;  %p966_p8 = scmp.ne.s32.totalorder %s1337_s14, %s965_s24 }
  0x5c   : > { %903 = vpow2.f32 %v343_v27  ;;  %v523_v36 = vadd.f32 %v522_v32, %v521_v24 }
  0x5d   : > { %905 = vpow2.f32 %v345_v28  ;;  %v506_v37 = vrot.slane %v505_v33, 1  ;;  %v512_v38 = vrot.slane %v511_v34, 1  ;;  %v518_v39 = vrot.slane %v517_v35, 1  ;;  %s1356_s17 = scalar_lea.hbm %s1490_s27, %s795_s18  ;;  %p967_p0 = pnand %p966_p8, %p1226_p9 }
  0x5e   : > { %v524_v40 = vrot.slane %v523_v36, 1 }
  0x5f   : > { %v507_v41 = vadd.f32 %v506_v37, %v505_v33  ;;  %v513_v42 = vadd.f32 %v512_v38, %v511_v34  ;;  %v519_v43 = vadd.f32 %v518_v39, %v517_v35  ;;  %s1364_s4 = scalar_lea.hbm %s1491_s2, %s795_s18  ;;  %p968_p1 = pneg %p967_p0 }
  0x60   : > { %v525_v44 = vadd.f32 %v524_v40, %v523_v36 }
  0x61   : > { %v530_v45 = vsel %vm453_vm4, %v513_v42, %v507_v41 }
  0x62   : > { %v531_v46 = vsel %vm455_vm5, %v519_v43, %v530_v45 }
  0x63   : > { %v532_v47 = vsel %vm457_vm6, %v525_v44, %v531_v46 }
  0x64   : > { %534 = vst [vmem:[%s308_s30] sm:$0xf] %v532_v47  ;;  %s1129_s30 = smov [#allocation11]  }
  0x65   : > { %s969_s29 = sshll.u32 %s1129_s30, 4  ;;  %s970_s29 = int_to_ptr.vmem [resolvable:$false] %s969_s29 }
  0x66   : > { %s971_s13 = scalar_lea.vmem %s970_s29, 128  ;;  %p972_p13 = scmp.lt.s32.totalorder %s1337_s14, %s970_s29 }
  0x67   : > { %v900_v48 = vpop.eup %899  ;;  %p973_p2 = scmp.lt.s32.totalorder %s971_s13, %s965_s24 }
  0x68   : > { %v902_v49 = vpop.eup %901 }
  0x69   : > { %v904_v50 = vpop.eup %903  ;;  %v347_v51 = vadd.f32 %v902_v49, %v900_v48  ;;  %p974_p4 = por %p973_p2, %p972_p13 }
  0x6a   : > { %v906_v52 = vpop.eup %905 }
  0x6b   : > { %v348_v53 = vadd.f32 %v904_v50, %v347_v51  ;;  %p975_p5 = pnand %p974_p4, %p968_p1 }
  0x6d   : > { %v349_v54 = vadd.f32 %v906_v52, %v348_v53 }
  0x6f   : > { %907 = vrcp.f32 %v349_v54 }
  0x7c   : > { %v908_v55 = vpop.eup %907 }
  0x7d   : > { %v351_v56 = vmul.f32 %v908_v55, %v900_v48  ;;  %v352_v57 = vmul.f32 %v908_v55, %v902_v49  ;;  %v353_v58 = vmul.f32 %v908_v55, %v904_v50  ;;  %v354_v59 = vmul.f32 %v908_v55, %v906_v52 }
  0x7f   : > { %v395_v60 = vmul.f32 %v351_v56, %v351_v56  ;;  %v396_v61 = vmul.f32 %v352_v57, %v352_v57  ;;  %v397_v62 = vmul.f32 %v353_v58, %v353_v58  ;;  %v398_v63 = vmul.f32 %v354_v59, %v354_v59 }
  0x80   : > { %v363_v0 = vsel %vm355_vm0, %v351_v56, 0.0  ;;  %v364_v1 = vsel %vm356_vm1, %v352_v57, 0.0  ;;  %v365_v2 = vsel %vm357_vm2, %v353_v58, 0.0  ;;  %v366_v3 = vsel %vm358_vm3, %v354_v59, 0.0 }
  0x81   : > { %v402_v5 = vsel %vm399_vm7, %v395_v60, 0.0  ;;  %v403_v6 = vsel %vm399_vm7, %v396_v61, 0.0  ;;  %v404_v7 = vsel %vm399_vm7, %v397_v62, 0.0  ;;  %v405_v8 = vsel %vm399_vm7, %v398_v63, 0.0 }
  0x82   : > { %v465_v9 = vrot.slane %v402_v5, 4  ;;  %v471_v10 = vrot.slane %v403_v6, 4  ;;  %v477_v11 = vrot.slane %v404_v7, 4  ;;  %v483_v12 = vrot.slane %v405_v8, 4 }
  0x83   : > { %v425_v13 = vrot.slane %v363_v0, 4  ;;  %v431_v14 = vrot.slane %v364_v1, 4  ;;  %v437_v15 = vrot.slane %v365_v2, 4  ;;  %v443_v16 = vrot.slane %v366_v3, 4 }
  0x84   : > { %v466_v17 = vadd.f32 %v465_v9, %v402_v5  ;;  %v472_v18 = vadd.f32 %v471_v10, %v403_v6  ;;  %v478_v19 = vadd.f32 %v477_v11, %v404_v7  ;;  %v484_v20 = vadd.f32 %v483_v12, %v405_v8 }
  0x85   : > { %v426_v21 = vadd.f32 %v425_v13, %v363_v0  ;;  %v432_v4 = vadd.f32 %v431_v14, %v364_v1  ;;  %v438_v22 = vadd.f32 %v437_v15, %v365_v2  ;;  %v444_v23 = vadd.f32 %v443_v16, %v366_v3 }
  0x86   : > { %v467_v24 = vrot.slane %v466_v17, 2  ;;  %v473_v25 = vrot.slane %v472_v18, 2  ;;  %v479_v26 = vrot.slane %v478_v19, 2  ;;  %v485_v27 = vrot.slane %v484_v20, 2 }
  0x87   : > { %v427_v28 = vrot.slane %v426_v21, 2  ;;  %v433_v29 = vrot.slane %v432_v4, 2  ;;  %v439_v30 = vrot.slane %v438_v22, 2  ;;  %v445_v31 = vrot.slane %v444_v23, 2 }
  0x88   : > { %v468_v32 = vadd.f32 %v467_v24, %v466_v17  ;;  %v474_v33 = vadd.f32 %v473_v25, %v472_v18  ;;  %v480_v34 = vadd.f32 %v479_v26, %v478_v19  ;;  %v486_v35 = vadd.f32 %v485_v27, %v484_v20 }
  0x89   : > { %v428_v36 = vadd.f32 %v427_v28, %v426_v21  ;;  %v434_v37 = vadd.f32 %v433_v29, %v432_v4  ;;  %v440_v38 = vadd.f32 %v439_v30, %v438_v22  ;;  %v446_v39 = vadd.f32 %v445_v31, %v444_v23 }
  0x8a   : > { %v469_v40 = vrot.slane %v468_v32, 1  ;;  %v475_v41 = vrot.slane %v474_v33, 1  ;;  %v481_v42 = vrot.slane %v480_v34, 1  ;;  %v487_v43 = vrot.slane %v486_v35, 1 }
  0x8b   : > { %v429_v44 = vrot.slane %v428_v36, 1  ;;  %v435_v45 = vrot.slane %v434_v37, 1  ;;  %v441_v46 = vrot.slane %v440_v38, 1  ;;  %v447_v47 = vrot.slane %v446_v39, 1 }
  0x8c   : > { %v470_v48 = vadd.f32 %v469_v40, %v468_v32  ;;  %v476_v49 = vadd.f32 %v475_v41, %v474_v33  ;;  %v482_v50 = vadd.f32 %v481_v42, %v480_v34  ;;  %v488_v51 = vadd.f32 %v487_v43, %v486_v35 }
  0x8d   : > { %v430_v52 = vadd.f32 %v429_v44, %v428_v36  ;;  %v436_v53 = vadd.f32 %v435_v45, %v434_v37  ;;  %v442_v54 = vadd.f32 %v441_v46, %v440_v38  ;;  %v448_v55 = vadd.f32 %v447_v47, %v446_v39 }
  0x8e   : > { %v493_v56 = vsel %vm453_vm4, %v476_v49, %v470_v48 }
  0x8f   : > { %v494_v57 = vsel %vm455_vm5, %v482_v50, %v493_v56  ;;  %v454_v58 = vsel %vm453_vm4, %v436_v53, %v430_v52 }
  0x90   : > { %v495_v59 = vsel %vm457_vm6, %v488_v51, %v494_v57  ;;  %v456_v60 = vsel %vm455_vm5, %v442_v54, %v454_v58 }
  0x91   : > { %497 = vst [vmem:[%s301_s19] sm:$0xf] %v495_v59  ;;  %v458_v61 = vsel %vm457_vm6, %v448_v55, %v456_v60 }
  0x92   : > { %460 = vst [vmem:[%s294_s28] sm:$0xf] %v458_v61 }
  0x93   : > { %978 = shalt.err (!%p975_p5)
}
  0x94   : > { %s979_s19 = scalar_lea.hbm %s1349_s25, 64  ;;  %s983_s18 = scalar_lea.hbm %s1464_s3, 256 }
  0x95   : > { %p980_p6 = scmp.ne.s32.totalorder %s1349_s25, %s979_s19  ;;  %p984_p10 = scmp.lt.s32.totalorder %s1349_s25, %s1464_s3 }
  0x96   : > { %p985_p11 = scmp.lt.s32.totalorder %s983_s18, %s979_s19 }
  0x97   : > { %p981_p3 = pnand %p980_p6, %p1226_p9 }
  0x98   : > { %p986_p8 = por %p985_p11, %p984_p10 }
  0x99   : > { %p982_p7 = pneg %p981_p3 }
  0x9b   : > { %p987_p0 = pnand %p986_p8, %p982_p7 }
  0x9d   : > { %990 = shalt.err (!%p987_p0)
}
  0x9e   : > { %807 = dma.vmem_to_hbm [thread:$0]  (%p1226_p9), %s1337_s14, 64, %s1349_s25, %s1366_s15  }
  0x9f   : > { %s536_s26 = scalar_lea.sflag [#allocation7], %s1286_s0  ;;  %s991_s7 = scalar_lea.vmem %s1340_s10, 64 }
  0xa0   : > { %p992_p1 = scmp.ne.s32.totalorder %s1340_s10, %s991_s7  ;;  %s1130_s8 = smov [#allocation10]  }
  0xa1   : > { %s995_s9 = sshll.u32 %s1130_s8, 4  ;;  %s996_s9 = int_to_ptr.vmem [resolvable:$false] %s995_s9 }
  0xa2   : > { %p993_p13 = pnand %p992_p1, %p1226_p9  ;;  %s997_s24 = scalar_lea.vmem %s996_s9, 128 }
  0xa3   : > { %p998_p4 = scmp.lt.s32.totalorder %s1340_s10, %s996_s9  ;;  %p999_p5 = scmp.lt.s32.totalorder %s997_s24, %s991_s7 }
  0xa4   : > { %p994_p2 = pneg %p993_p13 }
  0xa5   : > { %p1000_p6 = por %p999_p5, %p998_p4 }
  0xa7   : > { %p1001_p3 = pnand %p1000_p6, %p994_p2 }
  0xa9   : > { %1004 = shalt.err (!%p1001_p3)
}
  0xaa   : > { %s1005_s14 = scalar_lea.hbm %s1356_s17, 64  ;;  %s1009_s30 = scalar_lea.hbm %s1490_s27, 256 }
  0xab   : > { %p1006_p7 = scmp.ne.s32.totalorder %s1356_s17, %s1005_s14  ;;  %p1010_p8 = scmp.lt.s32.totalorder %s1356_s17, %s1490_s27 }
  0xac   : > { %p1011_p0 = scmp.lt.s32.totalorder %s1009_s30, %s1005_s14 }
  0xad   : > { %p1007_p10 = pnand %p1006_p7, %p1226_p9 }
  0xae   : > { %p1012_p1 = por %p1011_p0, %p1010_p8 }
  0xaf   : > { %p1008_p11 = pneg %p1007_p10 }
  0xb1   : > { %p1013_p13 = pnand %p1012_p1, %p1008_p11 }
  0xb3   : > { %1016 = shalt.err (!%p1013_p13)
}
  0xb4   : > { %806 = dma.vmem_to_hbm [thread:$0]  (%p1226_p9), %s1340_s10, 64, %s1356_s17, %s536_s26  }
  0xb5   : > { %s1017_s19 = scalar_lea.vmem %s1359_s11, 64  ;;  %s1131_s28 = smov [#allocation13]  }
  0xb6   : > { %p1018_p2 = scmp.ne.s32.totalorder %s1359_s11, %s1017_s19  ;;  %s1021_s6 = sshll.u32 %s1131_s28, 4  ;;  %s1022_s6 = int_to_ptr.vmem [resolvable:$false] %s1021_s6 }
  0xb7   : > { %s1023_s18 = scalar_lea.vmem %s1022_s6, 128  ;;  %p1024_p6 = scmp.lt.s32.totalorder %s1359_s11, %s1022_s6 }
  0xb8   : > { %p1019_p4 = pnand %p1018_p2, %p1226_p9  ;;  %p1025_p3 = scmp.lt.s32.totalorder %s1023_s18, %s1017_s19 }
  0xba   : > { %p1020_p5 = pneg %p1019_p4  ;;  %p1026_p7 = por %p1025_p3, %p1024_p6 }
  0xbc   : > { %p1027_p10 = pnand %p1026_p7, %p1020_p5 }
  0xbe   : > { %1030 = shalt.err (!%p1027_p10)
}
  0xbf   : > { %s1031_s23 = scalar_lea.hbm %s1364_s4, 64  ;;  %s1035_s12 = scalar_lea.hbm %s1491_s2, 256 }
  0xc0   : > { %p1032_p11 = scmp.ne.s32.totalorder %s1364_s4, %s1031_s23  ;;  %p1036_p1 = scmp.lt.s32.totalorder %s1364_s4, %s1491_s2 }
  0xc1   : > { %p1037_p13 = scmp.lt.s32.totalorder %s1035_s12, %s1031_s23 }
  0xc2   : > { %p1033_p8 = pnand %p1032_p11, %p1226_p9 }
  0xc3   : > { %p1038_p2 = por %p1037_p13, %p1036_p1 }
  0xc4   : > { %p1034_p0 = pneg %p1033_p8 }
  0xc6   : > { %p1039_p4 = pnand %p1038_p2, %p1034_p0 }
  0xc8   : > { %1042 = shalt.err (!%p1039_p4)
}
  0xc9   : > { %808 = dma.vmem_to_hbm [thread:$0]  (%p1226_p9), %s1359_s11, 64, %s1364_s4, %s1366_s15  }
  0xca PF: > { %s1492_s8 = sld [smem:[#allocation18_spill]]  ;;  %p830_p5 = scmp.ge.s32.totalorder %s1121_s22, 2 }
  0xcc   : > { %p820_p6 = pnand %p830_p5, %p1234_p12 }
  0xce   : > { %p821_p3 = pneg %p820_p6 }
  0xd0   : > { %s603_s24 = sand.u32 1, %s1492_s8  }
  0xd1   : > { %s604_s14 = scalar_lea.sflag [#allocation7], %s603_s24 }
  0xd2   : > { %1084 = dma.done.wait (%p821_p3), %s604_s14, 64  }
  0xd3   : > { %1086 = vsyncadd (%p821_p3), %s604_s14, 4294967232  ;;  %s1494_s0 = sadd.s32 4294967294, %s1121_s22  }
  0xd4   : > { %s612_s25 = sand.u32 1, %s1494_s0  }
  0xd5   : > { %s613_s5 = scalar_lea.sflag [#allocation12], %s612_s25 }
  0xd6   : > { %1088 = dma.done.wait (%p821_p3), %s613_s5, 128  }
  0xd7   : > { %1090 = vsyncadd (%p821_p3), %s613_s5, 4294967168  ;;  %s27_s22 = sadd.s32 1, %s1121_s22   ;;  %s1495_s11 = sld [smem:[#allocation19_spill]] }
  0xd8   : > { %p24_p9 = scmp.ge.s32.totalorder %s27_s22, 6   ;;  %s1496_s17 = sld [smem:[#allocation23_spill]] }
  0xd9   : > { %s1497_s4 = sld [smem:[#allocation20_spill]]  ;;  %s1499_s15 = smov %s1097_s16 }
  0xda   : > { %s1498_s30 = sld [smem:[#allocation21_spill]]  ;;  %s1501_s18 = smov %s1113_s20 }
  0xdb   : > { %s1502_s19 = smov %s1117_s21 }
  0xdc   :  { %26 = sbr.rel (!%p24_p9) target bundleno = 15 (0xf), region = 126 }
  0xdd   : > { %s1500_s16 = smov %s1495_s11 }
  0xdf   : > { %s1503_s20 = smov %s1497_s4 }
  0xe0   : > { %s1504_s21 = smov %s1498_s30 }
  0xe1   :  { %627 = vsyncpa [#allocation6], 1 }
  0xe2   :  { %629 = vsyncpa [#allocation6 + $0x1], 1 }
  0xe3   :  { %630 = vsyncpa [#allocation9], 1 }
  0xe4   :  { %632 = vsyncpa [#allocation9 + $0x1], 1 }
  0xe5   :  { %633 = vsyncpa [#allocation7], 1 }
  0xe6   :  { %635 = vsyncpa [#allocation7 + $0x1], 1 }
  0xe7   :  { %636 = vsyncpa [#allocation12], 1 }
  0xe8   :  { %638 = vsyncpa [#allocation12 + $0x1], 1 }

</bundles_post_ra>
